<compile_context>
chip_gen: v7x
topology: tpu7x:2x2x1
jax: 0.10.0
libtpu: 0.0.40
codegen_flags: <defaults>
</compile_context>

<pallas_src>
import jax
import jax.numpy as jnp
from jax.experimental import pallas as pl
from jax.experimental.pallas import tpu as pltpu


# ----------------------------- kernels --------------------------------------


def _elu(z):
    # ELU(alpha=1). Clamp before exp so the (discarded) positive lanes can't overflow.
    return jnp.where(z > 0, z, jnp.exp(jnp.minimum(z, 0.0)) - 1.0)


def _fused_kernel(at_ref, xw1t_ref, b1t_ref, w2t_ref, b2t_ref, wlt_ref, bl_ref,
                  out_ref):
    """Small/medium graphs: whole A^T resident in VMEM (grid-less call -> single
    buffered), loaded from HBM exactly once and reused by both GCN layers."""
    at = at_ref[...]
    h1t = _elu(jnp.dot(xw1t_ref[...], at, preferred_element_type=jnp.float32)
               + b1t_ref[...])
    hw2t = jnp.dot(w2t_ref[...], h1t.astype(w2t_ref.dtype),
                   preferred_element_type=jnp.float32)
    h2t = _elu(jnp.dot(hw2t.astype(at.dtype), at,
                       preferred_element_type=jnp.float32) + b2t_ref[...])
    out_ref[...] = (jnp.dot(wlt_ref[...], h2t, preferred_element_type=jnp.float32)
                    + bl_ref[...])


def _layer1_kernel(at_ref, xw1t_ref, b1t_ref, w2t_ref, hw2t_ref, acc_ref):
    """K-tiled: acc += (X W1)^T[:, K] @ A^T[K, J]; at last K emit W2^T @ ELU(acc+b1)."""
    k = pl.program_id(1)

    @pl.when(k == 0)
    def _():
        acc_ref[...] = jnp.zeros_like(acc_ref)

    acc_ref[...] += jnp.dot(xw1t_ref[...], at_ref[...],
                            preferred_element_type=jnp.float32)

    @pl.when(k == pl.num_programs(1) - 1)
    def _():
        h1t = _elu(acc_ref[...] + b1t_ref[...])
        hw2t_ref[...] = jnp.dot(
            w2t_ref[...], h1t.astype(w2t_ref.dtype),
            preferred_element_type=jnp.float32).astype(hw2t_ref.dtype)


def _layer2_head_kernel(at_ref, hw2t_ref, b2t_ref, wlt_ref, bl_ref, out_ref,
                        acc_ref):
    """K-tiled: acc += (h1 W2)^T[:, K] @ A^T[K, J]; at last K emit the linear head."""
    k = pl.program_id(1)

    @pl.when(k == 0)
    def _():
        acc_ref[...] = jnp.zeros_like(acc_ref)

    acc_ref[...] += jnp.dot(hw2t_ref[...], at_ref[...],
                            preferred_element_type=jnp.float32)

    @pl.when(k == pl.num_programs(1) - 1)
    def _():
        h2t = _elu(acc_ref[...] + b2t_ref[...])
        out_ref[...] = (jnp.dot(wlt_ref[...], h2t,
                                preferred_element_type=jnp.float32) + bl_ref[...])


# ----------------------------- wrappers --------------------------------------


def _round_up(x, m):
    return (x + m - 1) // m * m


def _vmem_capacity_bytes():
    try:
        return int(pltpu.get_tpu_info().vmem_capacity_bytes)
    except Exception:
        return 64 * 1024 * 1024  # conservative: v7x per-TensorCore VMEM


def build_normalized_adj_t(edge_index, edge_weight, num_nodes, n_pad,
                           dtype=jnp.bfloat16):
    """A_hat^T built DIRECTLY transposed, padded to (n_pad, n_pad) and cast to `dtype`
    in one fused XLA chain (no separate O(N^2) transpose/cast HBM pass)."""
    src, dst = edge_index[0], edge_index[1]
    at = jnp.zeros((n_pad, n_pad), jnp.float32)
    # (A_w)^T[j, i] = weight(j -> i)   (the non-transposed build scatters a[dst, src]).
    at = at.at[src, dst].add(edge_weight.astype(jnp.float32))
    diag = jnp.arange(num_nodes)
    at = at.at[diag, diag].add(1.0)                 # self loops, weight 1
    deg = at.sum(axis=0)                            # col-sums of (A+I)^T == row-sums of A+I
    dinv = jnp.where(deg > 0, jax.lax.rsqrt(deg), 0.0)
    return (dinv[:, None] * at * dinv[None, :]).astype(dtype)


def _prep_params(x, w1, b1, w2, b2, wl, bl, n_pad, dtype):
    """Transposed operands; degenerate X @ W1 (K=4) matmul hoisted out of the kernel."""
    n, n1, n2 = x.shape[0], w1.shape[1], w2.shape[1]
    xw1 = x.astype(jnp.float32) @ w1.astype(jnp.float32)              # (n, n1), tiny
    xw1t = jnp.pad(xw1, ((0, n_pad - n), (0, 0))).T.astype(dtype)     # (n1, n_pad)
    b1t = b1.reshape(n1, 1).astype(jnp.float32)
    w2t = w2.T.astype(dtype)                                          # (n2, n1)
    b2t = b2.reshape(n2, 1).astype(jnp.float32)
    wlt = wl.reshape(n2, 1).T.astype(jnp.float32)                     # (1, n2)
    blv = bl.reshape(1, 1).astype(jnp.float32)
    return xw1t, b1t, w2t, b2t, wlt, blv


def _gcn_fused(at, xw1t, b1t, w2t, b2t, wlt, blv, *, n, vmem_limit):
    """Grid-less pallas_call: every operand mapped whole into VMEM (single buffered)."""
    n_pad = at.shape[0]
    out2d = pl.pallas_call(
        _fused_kernel,
        out_shape=jax.ShapeDtypeStruct((1, n_pad), jnp.float32),
        compiler_params=pltpu.CompilerParams(vmem_limit_bytes=vmem_limit),
    )(at, xw1t, b1t, w2t, b2t, wlt, blv)
    return out2d[0, :n]


def _gcn_tiled(at, xw1t, b1t, w2t, b2t, wlt, blv, *, n, tm, tk, vmem_limit):
    """Two pallas_calls with a (node-tile, K-tile) grid; node axis parallel (megacore),
    K axis arbitrary with a VMEM f32 accumulator.  VMEM use is independent of N."""
    n_pad = at.shape[0]
    n1, n2 = xw1t.shape[0], w2t.shape[0]
    grid = (n_pad // tm, n_pad // tk)
    params = pltpu.CompilerParams(
        dimension_semantics=("parallel", "arbitrary"),
        vmem_limit_bytes=vmem_limit)

    at_spec = pl.BlockSpec((tk, tm), lambda i, k: (k, i))

    def const_spec(shape):
        return pl.BlockSpec(shape, lambda i, k: (0, 0))

    # ---- call 1: hw2t = W2^T @ ELU((X W1)^T @ A^T + b1)  -> (n2, n_pad) ----
    hw2t = pl.pallas_call(
        _layer1_kernel,
        grid=grid,
        out_shape=jax.ShapeDtypeStruct((n2, n_pad), at.dtype),
        in_specs=[at_spec,
                  pl.BlockSpec((n1, tk), lambda i, k: (0, k)),
                  const_spec(b1t.shape),
                  const_spec(w2t.shape)],
        out_specs=pl.BlockSpec((n2, tm), lambda i, k: (0, i)),
        scratch_shapes=[pltpu.VMEM((n1, tm), jnp.float32)],
        compiler_params=params,
    )(at, xw1t, b1t, w2t)

    # ---- call 2: out = wl^T @ ELU(hw2t @ A^T + b2) + bl  -> (1, n_pad) lane-dense ----
    out2d = pl.pallas_call(
        _layer2_head_kernel,
        grid=grid,
        out_shape=jax.ShapeDtypeStruct((1, n_pad), jnp.float32),
        in_specs=[at_spec,
                  pl.BlockSpec((n2, tk), lambda i, k: (0, k)),
                  const_spec(b2t.shape),
                  const_spec(wlt.shape),
                  const_spec(blv.shape)],
        out_specs=pl.BlockSpec((1, tm), lambda i, k: (0, i)),
        scratch_shapes=[pltpu.VMEM((n2, tm), jnp.float32)],
        compiler_params=params,
    )(at, hw2t, b2t, wlt, blv)

    return out2d[0, :n]


def gcn_forward(edge_index, edge_weight, x, w1, b1, w2, b2, wl, bl, *,
                tile=None, force_tiled=False, compute_dtype=jnp.bfloat16):
    """Full GCN forward.  Resident-A fused path when A fits ~0.65*VMEM (A streamed from
    HBM once, single-buffered); otherwise the K-tiled two-call pipeline (tm=tk=512
    default, double-buffered blocks, megacore-parallel node axis)."""
    n = x.shape[0]
    cap = _vmem_capacity_bytes()
    vmem_limit = int(cap * 0.8)
    itemsize = jnp.dtype(compute_dtype).itemsize

    # ---------------- fused (resident-A) path ----------------
    n128 = _round_up(max(n, 128), 128)
    # A (single buffered) + the O(N) feature slabs / in-kernel f32 temporaries.
    fused_bytes = n128 * n128 * itemsize + n128 * 640
    if not force_tiled and fused_bytes <= int(cap * 0.65):
        at = build_normalized_adj_t(edge_index, edge_weight, n, n128, compute_dtype)
        ps = _prep_params(x, w1, b1, w2, b2, wl, bl, n128, compute_dtype)
        return _gcn_fused(at, *ps, n=n, vmem_limit=vmem_limit)

    # ---------------- K-tiled two-call pipeline ----------------
    t = 512 if tile is None else int(tile)
    assert t % 128 == 0, "tile must be a multiple of 128 lanes"
    n_pad = _round_up(n, t)
    # Padded rows/cols of A^T are zero, so garbage in the padded columns of the
    # intermediate slab is annihilated; padded outputs are sliced off.
    at = build_normalized_adj_t(edge_index, edge_weight, n, n_pad, compute_dtype)
    ps = _prep_params(x, w1, b1, w2, b2, wl, bl, n_pad, compute_dtype)
    return _gcn_tiled(at, *ps, n=n, tm=t, tk=t, vmem_limit=vmem_limit)


# ----------------------------- reference / glue ------------------------------


def build_normalized_adj(edge_index, edge_weight, num_nodes):
    """Dense PyG-style normalization (f32, non-transposed) — reference only."""
    src, dst = edge_index[0], edge_index[1]
    a = jnp.zeros((num_nodes, num_nodes), jnp.float32)
    a = a.at[dst, src].add(edge_weight)
    a = a + jnp.eye(num_nodes, dtype=jnp.float32)
    deg = a.sum(axis=1)
    dinv = jnp.where(deg > 0, 1.0 / jnp.sqrt(deg), 0.0)
    return dinv[:, None] * a * dinv[None, :]


def gcn_reference(a_hat, x, w1, b1, w2, b2, wl, bl):
    """Pure-JAX f32 reference of the module's eval-mode forward."""
    h = a_hat @ (x @ w1) + b1.reshape(1, -1)
    h = jnp.where(h > 0, h, jnp.exp(jnp.minimum(h, 0.0)) - 1.0)
    h = a_hat @ (h @ w2) + b2.reshape(1, -1)
    h = jnp.where(h > 0, h, jnp.exp(jnp.minimum(h, 0.0)) - 1.0)
    return (h @ wl.reshape(-1, 1) + bl.reshape(1, 1)).reshape(-1)


def glorot(key, shape):
    fan_in, fan_out = shape[0], shape[1]
    lim = jnp.sqrt(6.0 / (fan_in + fan_out))
    return jax.random.uniform(key, shape, jnp.float32, -lim, lim)


if __name__ == "__main__":
    # Small synthetic graph consistent with the module:
    #   num_node_features=4, num_gcn_layers=2, n_nodes1=32, n_nodes2=16
    N, F_IN, N1, N2, E = 200, 4, 32, 16, 600

    key = jax.random.PRNGKey(0)
    k_x, k_e1, k_e2, k_w, k1, k2, k3, k4, k5, k6 = jax.random.split(key, 10)

    x = jax.random.normal(k_x, (N, F_IN), jnp.float32)
    edge_index = jnp.stack([
        jax.random.randint(k_e1, (E,), 0, N),
        jax.random.randint(k_e2, (E,), 0, N),
    ])                                                    # (2, E)
    edge_weight = jax.random.uniform(k_w, (E,), jnp.float32, 0.1, 1.0)

    # Deterministic parameters (shapes from GCN.__init__).
    w1 = glorot(k1, (F_IN, N1))
    b1 = jax.random.normal(k2, (N1,), jnp.float32) * 0.01
    w2 = glorot(k3, (N1, N2))
    b2 = jax.random.normal(k4, (N2,), jnp.float32) * 0.01
    wl = glorot(k5, (N2, 1))
    bl = jax.random.normal(k6, (1, 1), jnp.float32) * 0.01

    # Auto path (small graph -> grid-less resident-A fused kernel).
    out_fused = gcn_forward(edge_index, edge_weight, x, w1, b1, w2, b2, wl, bl)
    # Force the K-tiled two-call pipeline with a multi-step grid (200 -> pad 256, 2x2 grid)
    # to exercise the accumulator init/finalize path.
    out_tiled = gcn_forward(edge_index, edge_weight, x, w1, b1, w2, b2, wl, bl,
                            force_tiled=True, tile=128)
    jax.block_until_ready((out_fused, out_tiled))

    a_hat = build_normalized_adj(edge_index, edge_weight, N)
    ref = gcn_reference(a_hat, x, w1, b1, w2, b2, wl, bl)
    assert out_fused.shape == (N,) and out_tiled.shape == (N,)
    assert bool(jnp.allclose(out_fused, ref, rtol=5e-2, atol=5e-2))
    assert bool(jnp.allclose(out_tiled, ref, rtol=5e-2, atol=5e-2))
    print("KERNEL_OK")
</pallas_src>

<mosaic_0001>
module attributes {stable_mosaic.version = 11 : i64} {
  func.func @_fused_kernel(%arg0: memref<256x256xbf16, #tpu.memory_space<vmem>>, %arg1: memref<32x256xbf16, #tpu.memory_space<vmem>>, %arg2: memref<32x1xf32, #tpu.memory_space<vmem>>, %arg3: memref<16x32xbf16, #tpu.memory_space<vmem>>, %arg4: memref<16x1xf32, #tpu.memory_space<vmem>>, %arg5: memref<1x16xf32, #tpu.memory_space<vmem>>, %arg6: memref<1x1xf32, #tpu.memory_space<vmem>>, %arg7: memref<1x256xf32, #tpu.memory_space<vmem>>) attributes {dimension_semantics = [], scalar_prefetch = 0 : i64, scratch_operands = 0 : i64, tpu.core_type = #tpu.core_type<tc>} {
    %c0 = arith.constant 0 : index
    %c0_0 = arith.constant 0 : index
    %0 = vector.load %arg0[%c0, %c0_0] : memref<256x256xbf16, #tpu.memory_space<vmem>>, vector<256x256xbf16>
    %c0_1 = arith.constant 0 : index
    %c0_2 = arith.constant 0 : index
    %1 = vector.load %arg1[%c0_1, %c0_2] : memref<32x256xbf16, #tpu.memory_space<vmem>>, vector<32x256xbf16>
    %cst = arith.constant dense<0.000000e+00> : vector<32x256xf32>
    %2 = tpu.matmul %1, %0, %cst {dimension_numbers = #tpu.dot_dimension_numbers<[1], [0], [0], [1], [0, 0, 1, 1], [], []>} : vector<32x256xbf16>, vector<256x256xbf16>, vector<32x256xf32> -> vector<32x256xf32>
    %c0_3 = arith.constant 0 : index
    %c0_4 = arith.constant 0 : index
    %3 = vector.load %arg2[%c0_3, %c0_4] : memref<32x1xf32, #tpu.memory_space<vmem>>, vector<32x1xf32>
    %4 = vector.broadcast %3 : vector<32x1xf32> to vector<32x256xf32>
    %5 = arith.addf %2, %4 : vector<32x256xf32>
    %cst_5 = arith.constant 0.000000e+00 : f32
    %6 = vector.broadcast %cst_5 : f32 to vector<32x256xf32>
    %7 = arith.cmpf ogt, %5, %6 : vector<32x256xf32>
    %cst_6 = arith.constant 0.000000e+00 : f32
    %8 = vector.broadcast %cst_6 : f32 to vector<32x256xf32>
    %9 = arith.minimumf %5, %8 : vector<32x256xf32>
    %10 = math.exp %9 : vector<32x256xf32>
    %cst_7 = arith.constant 1.000000e+00 : f32
    %11 = vector.broadcast %cst_7 : f32 to vector<32x256xf32>
    %12 = arith.subf %10, %11 : vector<32x256xf32>
    %13 = arith.select %7, %5, %12 : vector<32x256xi1>, vector<32x256xf32>
    %c0_8 = arith.constant 0 : index
    %c0_9 = arith.constant 0 : index
    %14 = vector.load %arg3[%c0_8, %c0_9] : memref<16x32xbf16, #tpu.memory_space<vmem>>, vector<16x32xbf16>
    %15 = arith.truncf %13 : vector<32x256xf32> to vector<32x256xbf16>
    %cst_10 = arith.constant dense<0.000000e+00> : vector<16x256xf32>
    %16 = tpu.matmul %14, %15, %cst_10 {dimension_numbers = #tpu.dot_dimension_numbers<[1], [0], [0], [1], [0, 0, 1, 1], [], []>} : vector<16x32xbf16>, vector<32x256xbf16>, vector<16x256xf32> -> vector<16x256xf32>
    %17 = arith.truncf %16 : vector<16x256xf32> to vector<16x256xbf16>
    %cst_11 = arith.constant dense<0.000000e+00> : vector<16x256xf32>
    %18 = tpu.matmul %17, %0, %cst_11 {dimension_numbers = #tpu.dot_dimension_numbers<[1], [0], [0], [1], [0, 0, 1, 1], [], []>} : vector<16x256xbf16>, vector<256x256xbf16>, vector<16x256xf32> -> vector<16x256xf32>
    %c0_12 = arith.constant 0 : index
    %c0_13 = arith.constant 0 : index
    %19 = vector.load %arg4[%c0_12, %c0_13] : memref<16x1xf32, #tpu.memory_space<vmem>>, vector<16x1xf32>
    %20 = vector.broadcast %19 : vector<16x1xf32> to vector<16x256xf32>
    %21 = arith.addf %18, %20 : vector<16x256xf32>
    %cst_14 = arith.constant 0.000000e+00 : f32
    %22 = vector.broadcast %cst_14 : f32 to vector<16x256xf32>
    %23 = arith.cmpf ogt, %21, %22 : vector<16x256xf32>
    %cst_15 = arith.constant 0.000000e+00 : f32
    %24 = vector.broadcast %cst_15 : f32 to vector<16x256xf32>
    %25 = arith.minimumf %21, %24 : vector<16x256xf32>
    %26 = math.exp %25 : vector<16x256xf32>
    %cst_16 = arith.constant 1.000000e+00 : f32
    %27 = vector.broadcast %cst_16 : f32 to vector<16x256xf32>
    %28 = arith.subf %26, %27 : vector<16x256xf32>
    %29 = arith.select %23, %21, %28 : vector<16x256xi1>, vector<16x256xf32>
    %c0_17 = arith.constant 0 : index
    %c0_18 = arith.constant 0 : index
    %30 = vector.load %arg5[%c0_17, %c0_18] : memref<1x16xf32, #tpu.memory_space<vmem>>, vector<1x16xf32>
    %cst_19 = arith.constant dense<0.000000e+00> : vector<1x256xf32>
    %31 = tpu.matmul %30, %29, %cst_19 {dimension_numbers = #tpu.dot_dimension_numbers<[1], [0], [0], [1], [0, 0, 1, 1], [], []>} : vector<1x16xf32>, vector<16x256xf32>, vector<1x256xf32> -> vector<1x256xf32>
    %c0_20 = arith.constant 0 : index
    %c0_21 = arith.constant 0 : index
    %32 = vector.load %arg6[%c0_20, %c0_21] : memref<1x1xf32, #tpu.memory_space<vmem>>, vector<1x1xf32>
    %33 = vector.broadcast %32 : vector<1x1xf32> to vector<1x256xf32>
    %34 = arith.addf %31, %33 : vector<1x256xf32>
    %c0_22 = arith.constant 0 : index
    %c0_23 = arith.constant 0 : index
    %35 = vector.load %arg7[%c0_22, %c0_23] : memref<1x256xf32, #tpu.memory_space<vmem>>, vector<1x256xf32>
    tpu.vector_store %arg7[%c0_22, %c0_23], %34 {strides = array<i32>} : memref<1x256xf32, #tpu.memory_space<vmem>>, vector<1x256xf32>,
    return
  }
}

</mosaic_0001>

<bundles_post_ra>
// kernel: tpu_custom_call.1
= control target key start
LH: loop header
LB: loop body
LE: loop exit
PB: predicated region body
PF: predicated region fallthrough
CT: control target
= control target key end

     0   :  { %s1077_s0 = inlined_call_operand.hbm [shape: bf16[256,256], index: 0, kind: input, shape index: {}]   ;;  %s1078_s1 = inlined_call_operand.vmem [shape: bf16[32,256], index: 1, kind: input, shape index: {}]   ;;  %s1079_s2 = inlined_call_operand.vmem [shape: f32[32,1], index: 2, kind: input, shape index: {}]   ;;  %s1080_s3 = inlined_call_operand.vmem [shape: bf16[16,32], index: 3, kind: input, shape index: {}]   ;;  %s1081_s4 = inlined_call_operand.vmem [shape: f32[16,1], index: 4, kind: input, shape index: {}]   ;;  %s1082_s5 = inlined_call_operand.vmem [shape: f32[1,16], index: 5, kind: input, shape index: {}]   ;;  %s1083_s6 = inlined_call_operand.<no memory space> [shape: f32[1,1], index: 6, kind: input, shape index: {}]   ;;  %s1084_s7 = inlined_call_operand.hbm [shape: f32[1,256], index: 7, kind: output, shape index: {}]  }
   0x1   :  { %v12_v0 = vstv %s1083_s6 }
   0x2   :  { %13 = vst [vmem:[#allocation2] sm:$0x1] %v12_v0 }
   0x3   :  { %14 = vsyncpa [#allocation4], 0 }
   0x4   :  { %15 = vsyncpa [#allocation5], 0  ;;  %s839_s26 = smov [#allocation3]   ;;  %s791_s30 = scalar_lea.hbm %s1077_s0, 4096 }
   0x5   :  { %s21_s27 = sshll.u32 %s839_s26, 4  ;;  %p792_p0 = scmp.ne.s32.totalorder %s1077_s0, %s791_s30  ;;  %s22_s27 = int_to_ptr.vmem [resolvable:$true] %s21_s27 }
   0x6   :  { %p795_p1 = scmp.lt.u32.totalorder %s791_s30, %s1077_s0 }
   0x8   :  { %p797_p2 = pnand %p795_p1, %p792_p0 }
   0xa   :  { %800 = shalt.err (!%p797_p2)
}
   0xb   :  { %s801_s6 = scalar_lea.vmem %s22_s27, 4096  ;;  %p806_p4 = scmp.lt.s32.totalorder %s22_s27, %s22_s27 }
   0xc   :  { %p802_p3 = scmp.ne.s32.totalorder %s22_s27, %s801_s6  ;;  %p807_p5 = scmp.lt.s32.totalorder %s801_s6, %s801_s6 }
   0xe   :  { %p808_p6 = por %p807_p5, %p806_p4 }
  0x10   :  { %p809_p7 = pnand %p808_p6, %p802_p3 }
  0x12   :  { %812 = shalt.err (!%p809_p7)
}
  0x13   :  { %s840_s12 = smov 128   ;;  %s841_s13 = smov 8  }
  0x14   :  { %27 = dma.hbm_to_vmem [thread:$0]  %s1077_s0, 4096, %s22_s27, [#allocation4], %s840_s12, %s840_s12, %s841_s13  }
  0x15   :  { %835 = dma.done.wait [#allocation4], 4096  }
  0x16   :  { %836 = vsyncadd [#allocation4], 4294963200  ;;  %v842_v1 = vmov 0   ;;  %v901_v2 = vld [vmem:[#allocation3 + $0x4] ss:$8 sps:$4 sm:$0xff]   ;;  %v83_v21 = vld [vmem:[%s1079_s2 + $0x18] sm:$0xff] }
  0x17   :  { %710 = vset.pattern.permute.xlu0 %v842_v1  ;;  %711 = vset.pattern.permute.xlu1 %v842_v1  ;;  %v903_v3 = vld [vmem:[#allocation3] ss:$8 sps:$4 sm:$0xff]   ;;  %v906_v4 = vld [vmem:[#allocation3 + $0x14] ss:$8 sps:$4 sm:$0xff]   ;;  %v909_v5 = vld [vmem:[#allocation3 + $0x10] ss:$8 sps:$4 sm:$0xff]  }
  0x18   :  { %432 = vmatprep.mubr.bf16.mxu1 %v842_v1  ;;  %284 = vmatprep.subr.bf16.mxu0 %v901_v2  ;;  %v912_v6 = vld [vmem:[#allocation3 + $0x24] ss:$8 sps:$4 sm:$0xff]   ;;  %v915_v7 = vld [vmem:[#allocation3 + $0x20] ss:$8 sps:$4 sm:$0xff]   ;;  %v918_v8 = vld [vmem:[#allocation3 + $0x34] ss:$8 sps:$4 sm:$0xff]  }
  0x19   :  { %285 = vmatpush1.bf16.msra.mxu0 %v903_v3  ;;  %v921_v9 = vld [vmem:[#allocation3 + $0x30] ss:$8 sps:$4 sm:$0xff]   ;;  %v924_v10 = vld [vmem:[#allocation3 + $0x44] ss:$8 sps:$4 sm:$0xff]   ;;  %v927_v11 = vld [vmem:[#allocation3 + $0x40] ss:$8 sps:$4 sm:$0xff]  }
  0x1a   :  { %286 = vmatprep.subr.bf16.mxu0 %v906_v4  ;;  %v930_v12 = vld [vmem:[#allocation3 + $0x54] ss:$8 sps:$4 sm:$0xff]   ;;  %v933_v13 = vld [vmem:[#allocation3 + $0x50] ss:$8 sps:$4 sm:$0xff]   ;;  %v936_v14 = vld [vmem:[#allocation3 + $0x64] ss:$8 sps:$4 sm:$0xff]  }
  0x1b   :  { %v762_v15 = vld [vmem:[%s1078_s1 + $0x4] ss:$8 sps:$4 sm:$0xff]   ;;  %v945_v17 = vld [vmem:[#allocation3 + $0x74] ss:$8 sps:$4 sm:$0xff]   ;;  %v960_v22 = vld [vmem:[#allocation3 + $0x70] ss:$8 sps:$4 sm:$0xff]  }
  0x1c   :  { %v942_v16 = vld [vmem:[#allocation3 + $0x60] ss:$8 sps:$4 sm:$0xff]   ;;  %316 = vmatprep.mubr.bf16.mxu0 %v762_v15  ;;  %v82_v19 = vld [vmem:[%s1079_s2 + $0x10] sm:$0xff]  ;;  %v525_v28 = vld [vmem:[#allocation2] sm:$0x1]  ;;  %vm396_vm8 = vcmask 261120  }
  0x1d   :  { %287 = vmatpush1.bf16.msra.mxu0 %v909_v5  ;;  %v80_v18 = vld [vmem:[%s1079_s2] sm:$0xff]  ;;  %v81_v20 = vld [vmem:[%s1079_s2 + $0x8] sm:$0xff]  ;;  %96 = vperm.xlu1 %711, %v82_v19   ;;  %v978_v29 = vld [vmem:[#allocation3 + $0x90] ss:$8 sps:$4 sm:$0xff]   ;;  %vm535_vm13 = vcmask 130048   ;;  %s845_s6 = smov [#allocation6]  }
  0x1e   :  { %288 = vmatprep.subr.bf16.mxu0 %v912_v6  ;;  %86 = vperm.xlu0 %710, %v80_v18   ;;  %v963_v23 = vld [vmem:[#allocation3 + $0x84] ss:$8 sps:$4 sm:$0xff]   ;;  %v972_v26 = vld [vmem:[#allocation3 + $0x80] ss:$8 sps:$4 sm:$0xff]   ;;  %v975_v27 = vld [vmem:[#allocation3 + $0x94] ss:$8 sps:$4 sm:$0xff]  }
  0x1f   :  { %v445_v24 = vld [vmem:[%s1081_s4] sm:$0xff]  ;;  %v446_v25 = vld [vmem:[%s1081_s4 + $0x8] sm:$0xff]  ;;  %v990_v33 = vld [vmem:[#allocation3 + $0xb0] ss:$8 sps:$4 sm:$0xff]   ;;  %s639_s12 = sshll.u32 %s845_s6, 4  ;;  %s640_s12 = int_to_ptr.vmem [resolvable:$true] %s639_s12 }
  0x20   :  { %v981_v30 = vld [vmem:[#allocation3 + $0xa4] ss:$8 sps:$4 sm:$0xff]   ;;  %v984_v31 = vld [vmem:[#allocation3 + $0xa0] ss:$8 sps:$4 sm:$0xff]   ;;  %v987_v32 = vld [vmem:[#allocation3 + $0xb4] ss:$8 sps:$4 sm:$0xff]   ;;  %p818_p9 = scmp.lt.s32.totalorder %s640_s12, %s640_s12 }
  0x21   :  { %289 = vmatpush1.bf16.msra.mxu0 %v915_v7  ;;  %101 = vperm.xlu1 %711, %v83_v21   ;;  %v993_v34 = vld [vmem:[#allocation3 + $0xc4] ss:$8 sps:$4 sm:$0xff]   ;;  %v996_v35 = vld [vmem:[#allocation3 + $0xc0] ss:$8 sps:$4 sm:$0xff]   ;;  %v999_v36 = vld [vmem:[#allocation3 + $0xd4] ss:$8 sps:$4 sm:$0xff]  }
  0x22   :  { %290 = vmatprep.subr.bf16.mxu0 %v918_v8  ;;  %91 = vperm.xlu0 %710, %v81_v20   ;;  %v1002_v37 = vld [vmem:[#allocation3 + $0xd0] ss:$8 sps:$4 sm:$0xff]   ;;  %v1005_v38 = vld [vmem:[#allocation3 + $0xe4] ss:$8 sps:$4 sm:$0xff]   ;;  %v1008_v39 = vld [vmem:[#allocation3 + $0xe0] ss:$8 sps:$4 sm:$0xff]  }
  0x23   :  { %v1011_v40 = vld [vmem:[#allocation3 + $0xf4] ss:$8 sps:$4 sm:$0xff]   ;;  %v1014_v41 = vld [vmem:[#allocation3 + $0xf0] ss:$8 sps:$4 sm:$0xff]  }
  0x24   :  { %v760_v42 = vld [vmem:[%s1078_s1] ss:$8 sps:$4 sm:$0xff]   ;;  %v763_v43 = vld [vmem:[%s1078_s1 + $0x14] ss:$8 sps:$4 sm:$0xff]   ;;  %v765_v44 = vld [vmem:[%s1078_s1 + $0x10] ss:$8 sps:$4 sm:$0xff]  }
  0x25   :  { %291 = vmatpush1.bf16.msra.mxu0 %v921_v9  ;;  %454 = vperm.xlu1 %711, %v446_v25  }
  0x26   :  { %292 = vmatprep.subr.bf16.mxu0 %v924_v10  ;;  %449 = vperm.xlu0 %710, %v445_v24  }
  0x29   :  { %293 = vmatpush1.bf16.msra.mxu0 %v927_v11 }
  0x2a   :  { %294 = vmatprep.subr.bf16.mxu0 %v930_v12  ;;  %528 = vperm.xlu0 %710, %v525_v28  }
  0x2d   :  { %295 = vmatpush1.bf16.msra.mxu0 %v933_v13 }
  0x2e   :  { %296 = vmatprep.subr.bf16.mxu0 %v936_v14 }
  0x31   :  { %297 = vmatpush1.bf16.msra.mxu0 %v942_v16 }
  0x32   :  { %298 = vmatprep.subr.bf16.mxu0 %v945_v17 }
  0x35   :  { %299 = vmatpush1.bf16.msra.mxu0 %v960_v22 }
  0x36   :  { %300 = vmatprep.subr.bf16.mxu0 %v963_v23 }
  0x39   :  { %301 = vmatpush1.bf16.msra.mxu0 %v972_v26 }
  0x3a   :  { %302 = vmatprep.subr.bf16.mxu0 %v975_v27 }
  0x3d   :  { %303 = vmatpush1.bf16.msra.mxu0 %v978_v29 }
  0x3e   :  { %304 = vmatprep.subr.bf16.mxu0 %v981_v30 }
  0x41   :  { %305 = vmatpush1.bf16.msra.mxu0 %v984_v31 }
  0x42   :  { %306 = vmatprep.subr.bf16.mxu0 %v987_v32 }
  0x45   :  { %307 = vmatpush1.bf16.msra.mxu0 %v990_v33 }
  0x46   :  { %308 = vmatprep.subr.bf16.mxu0 %v993_v34 }
  0x49   :  { %309 = vmatpush1.bf16.msra.mxu0 %v996_v35 }
  0x4a   :  { %310 = vmatprep.subr.bf16.mxu0 %v999_v36 }
  0x4d   :  { %311 = vmatpush1.bf16.msra.mxu0 %v1002_v37 }
  0x4e   :  { %312 = vmatprep.subr.bf16.mxu0 %v1005_v38 }
  0x51   :  { %313 = vmatpush1.bf16.msra.mxu0 %v1008_v39 }
  0x52   :  { %314 = vmatprep.subr.bf16.mxu0 %v1011_v40 }
  0x55   :  { %315 = vmatpush1.bf16.msra.mxu0 %v1014_v41 }
  0x58   :  { %317 = vmatmul.mubr.bf16.vlgmr.msra.gmra.mrb[0].mxu0 %v760_v42 }
  0x59   :  { %326 = vmatprep.mubr.bf16.mxu0 %v763_v43 }
  0x60   :  { %327 = vmatmul.mubr.bf16.gmra.mrb[4].mxu0 %v765_v44 }
  0x9c   :  { %v97_v55 = vpop.permute.xlu1 %96 }
  0x9d   :  { %v87_v45 = vpop.permute.xlu0 %86 }
  0xa0   :  { %v102_v18 = vpop.permute.xlu1 %101 }
  0xa1   :  { %v92_v49 = vpop.permute.xlu0 %91 }
 0x12b   :  { %v318_v46 = vpop.f32.mrb[0].mxu0 }
 0x12c   :  { %v319_v47 = vadd.f32 %v318_v46, %v87_v45  ;;  %v320_v48 = vpop.f32.mrb[1].mxu0 }
 0x12d   :  { %v321_v50 = vadd.f32 %v320_v48, %v87_v45  ;;  %v322_v51 = vpop.f32.mrb[2].mxu0 }
 0x12e   :  { %v345_v52 = vmin.f32 %v319_v47, 0.0  ;;  %v323_v53 = vadd.f32 %v322_v51, %v92_v49  ;;  %v324_v54 = vpop.f32.mrb[3].mxu0  ;;  %vm337_vm0 = vcmp.gt.f32.partialorder %v319_v47, 0.0 }
 0x12f   :  { %v346_v56 = vmin.f32 %v321_v50, 0.0  ;;  %v325_v57 = vadd.f32 %v324_v54, %v92_v49  ;;  %vm338_vm2 = vcmp.gt.f32.partialorder %v321_v50, 0.0 }
 0x130   :  { %v353_v58 = vmul.f32 1.442695, %v345_v52  ;;  %v347_v59 = vmin.f32 %v323_v53, 0.0  ;;  %vm339_vm1 = vcmp.gt.f32.partialorder %v323_v53, 0.0 }
 0x131   :  { %v355_v60 = vmul.f32 1.442695, %v346_v56  ;;  %v348_v61 = vmin.f32 %v325_v57, 0.0  ;;  %vm340_vm3 = vcmp.gt.f32.partialorder %v325_v57, 0.0 }
 0x132   :  { %767 = vpow2.f32 %v353_v58  ;;  %v357_v62 = vmul.f32 1.442695, %v347_v59 }
 0x133   :  { %769 = vpow2.f32 %v355_v60  ;;  %v359_v63 = vmul.f32 1.442695, %v348_v61  ;;  %v328_v0 = vpop.f32.mrb[4].mxu0 }
 0x134   :  { %771 = vpow2.f32 %v357_v62  ;;  %v329_v1 = vadd.f32 %v328_v0, %v97_v55  ;;  %v330_v15 = vpop.f32.mrb[5].mxu0 }
 0x135   :  { %773 = vpow2.f32 %v359_v63  ;;  %v331_v19 = vadd.f32 %v330_v15, %v97_v55  ;;  %v332_v20 = vpop.f32.mrb[6].mxu0 }
 0x136   :  { %v349_v21 = vmin.f32 %v329_v1, 0.0  ;;  %v333_v24 = vadd.f32 %v332_v20, %v102_v18  ;;  %v334_v25 = vpop.f32.mrb[7].mxu0  ;;  %vm341_vm4 = vcmp.gt.f32.partialorder %v329_v1, 0.0 }
 0x137   :  { %v350_v28 = vmin.f32 %v331_v19, 0.0  ;;  %v335_v42 = vadd.f32 %v334_v25, %v102_v18  ;;  %vm342_vm6 = vcmp.gt.f32.partialorder %v331_v19, 0.0 }
 0x138   :  { %v361_v43 = vmul.f32 1.442695, %v349_v21  ;;  %v351_v44 = vmin.f32 %v333_v24, 0.0  ;;  %vm343_vm5 = vcmp.gt.f32.partialorder %v333_v24, 0.0 }
 0x139   :  { %v363_v45 = vmul.f32 1.442695, %v350_v28  ;;  %v352_v46 = vmin.f32 %v335_v42, 0.0  ;;  %vm344_vm7 = vcmp.gt.f32.partialorder %v335_v42, 0.0 }
 0x13a   :  { %775 = vpow2.f32 %v361_v43  ;;  %v365_v48 = vmul.f32 1.442695, %v351_v44 }
 0x13b   :  { %777 = vpow2.f32 %v363_v45  ;;  %v367_v49 = vmul.f32 1.442695, %v352_v46 }
 0x13c   :  { %v768_v51 = vpop.eup %767  ;;  %779 = vpow2.f32 %v365_v48 }
 0x13d   :  { %v770_v52 = vpop.eup %769  ;;  %781 = vpow2.f32 %v367_v49  ;;  %v684_v54 = vadd.f32 -1.0, %v768_v51  ;;  %v766_v51 = vld [vmem:[%s1080_s3] sm:$0xff]  }
 0x13e   :  { %v772_v55 = vpop.eup %771  ;;  %v685_v56 = vadd.f32 -1.0, %v770_v52 }
 0x13f   :  { %v774_v58 = vpop.eup %773  ;;  %v686_v59 = vadd.f32 -1.0, %v772_v55  ;;  %v377_v61 = vsel %vm337_vm0, %v319_v47, %v684_v54 }
 0x140   :  { %v687_v60 = vadd.f32 -1.0, %v774_v58  ;;  %v378_v63 = vsel %vm338_vm2, %v321_v50, %v685_v56  ;;  %v524_v56 = vld [vmem:[%s1082_s5] sm:$0x1]  ;;  %v531_v58 = vlaneseq  ;;  %s813_s5 = scalar_lea.vmem %s640_s12, 32 }
 0x141   :  { %v379_v62 = vsel %vm339_vm1, %v323_v53, %v686_v59  ;;  %p814_p8 = scmp.ne.s32.totalorder %s640_s12, %s813_s5  ;;  %p819_p10 = scmp.lt.s32.totalorder %s813_s5, %s813_s5 }
 0x142   :  { %v380_v0 = vsel %vm340_vm3, %v325_v57, %v687_v60  ;;  %v387_v15 = vpack.c.bf16 %v379_v62, %v377_v61  ;;  %v532_v59 = vshrl.u32 %v531_v58, 7  ;;  %v844_v60 = vmov 1966171168  }
 0x143   :  { %v388_v18 = vpack.c.bf16 %v380_v0, %v378_v63  ;;  %v614_v61 = vunpack.c.l.s4 %v844_v60  ;;  %vm630_vm14 = vcmp.lt.s32.totalorder %v531_v58, 256  ;;  %p820_p11 = por %p819_p10, %p818_p9 }
 0x144   :  { %v776_v20 = vpop.eup %775  ;;  %v533_v62 = vsub.s32 0, %v532_v59 }
 0x145   :  { %v778_v21 = vpop.eup %777  ;;  %v688_v25 = vadd.f32 -1.0, %v776_v20  ;;  %400 = vmatprep.subr.bf16.mxu1 %v388_v18  ;;  %v615_v0 = vunpack.c.0.s8 %v614_v61  ;;  %p821_p12 = pnand %p820_p11, %p814_p8 }
 0x146   :  { %v780_v28 = vpop.eup %779  ;;  %v689_v43 = vadd.f32 -1.0, %v778_v21  ;;  %401 = vmatpush1.bf16.msra.mxu1 %v387_v15 }
 0x147   :  { %v782_v44 = vpop.eup %781  ;;  %v690_v45 = vadd.f32 -1.0, %v780_v28  ;;  %v381_v47 = vsel %vm341_vm4, %v329_v1, %v688_v25  ;;  %v618_v28 = vsub.s32 %v615_v0, %v532_v59 }
 0x148   :  { %v691_v46 = vadd.f32 -1.0, %v782_v44  ;;  %v382_v50 = vsel %vm342_vm6, %v331_v19, %v689_v43 }
 0x149   :  { %v383_v53 = vsel %vm343_vm5, %v333_v24, %v690_v45 }
 0x14a   :  { %v384_v57 = vsel %vm344_vm7, %v335_v42, %v691_v46  ;;  %v389_v48 = vpack.c.bf16 %v383_v53, %v381_v47 }
 0x14b   :  { %v390_v49 = vpack.c.bf16 %v384_v57, %v382_v50 }
 0x14d   :  { %402 = vmatprep.subr.bf16.mxu1 %v390_v49 }
 0x14e   :  { %403 = vmatpush1.bf16.msra.mxu1 %v389_v48 }
 0x14f   :  { %457 = vmatprep.subr.bf16.mxu1 %v901_v2 }
 0x151   :  { %693 = vmatmul.mubr.msk.bf16.vlgmr.msra.gmra.mrb[0].mxu1 %vm396_vm8, %v766_v51 }
 0x152   :  { %458 = vmatpush1.bf16.msra.mxu1 %v903_v3 }
 0x153   :  { %459 = vmatprep.subr.bf16.mxu1 %v906_v4 }
 0x156   :  { %460 = vmatpush1.bf16.msra.mxu1 %v909_v5 }
 0x157   :  { %461 = vmatprep.subr.bf16.mxu1 %v912_v6 }
 0x15a   :  { %462 = vmatpush1.bf16.msra.mxu1 %v915_v7 }
 0x15b   :  { %463 = vmatprep.subr.bf16.mxu1 %v918_v8  ;;  %v843_v8 = vmov 0.0  }
 0x15c   :  { %603 = vmatprep.mubr.f32.mxu0 %v843_v8 }
 0x15e   :  { %464 = vmatpush1.bf16.msra.mxu1 %v921_v9  ;;  %v450_v9 = vpop.permute.xlu0 %449 }
 0x15f   :  { %465 = vmatprep.subr.bf16.mxu1 %v924_v10 }
 0x162   :  { %466 = vmatpush1.bf16.msra.mxu1 %v927_v11  ;;  %v529_v63 = vpop.permute.xlu0 %528 }
 0x163   :  { %467 = vmatprep.subr.bf16.mxu1 %v930_v12  ;;  %v534_v15 = vrot.slane %v529_v63, %v533_v62 }
 0x166   :  { %468 = vmatpush1.bf16.msra.mxu1 %v933_v13  ;;  %v455_v13 = vpop.permute.xlu1 %454 }
 0x167   :  { %469 = vmatprep.subr.bf16.mxu1 %v936_v14 }
 0x16a   :  { %470 = vmatpush1.bf16.msra.mxu1 %v942_v16 }
 0x16b   :  { %471 = vmatprep.subr.bf16.mxu1 %v945_v17 }
 0x16e   :  { %472 = vmatpush1.bf16.msra.mxu1 %v960_v22 }
 0x16f   :  { %473 = vmatprep.subr.bf16.mxu1 %v963_v23 }
 0x172   :  { %474 = vmatpush1.bf16.msra.mxu1 %v972_v26 }
 0x173   :  { %475 = vmatprep.subr.bf16.mxu1 %v975_v27 }
 0x176   :  { %476 = vmatpush1.bf16.msra.mxu1 %v978_v29 }
 0x177   :  { %477 = vmatprep.subr.bf16.mxu1 %v981_v30 }
 0x17a   :  { %478 = vmatpush1.bf16.msra.mxu1 %v984_v31 }
 0x17b   :  { %479 = vmatprep.subr.bf16.mxu1 %v987_v32 }
 0x17e   :  { %480 = vmatpush1.bf16.msra.mxu1 %v990_v33 }
 0x17f   :  { %481 = vmatprep.subr.bf16.mxu1 %v993_v34 }
 0x182   :  { %482 = vmatpush1.bf16.msra.mxu1 %v996_v35 }
 0x183   :  { %483 = vmatprep.subr.bf16.mxu1 %v999_v36 }
 0x186   :  { %484 = vmatpush1.bf16.msra.mxu1 %v1002_v37 }
 0x187   :  { %485 = vmatprep.subr.bf16.mxu1 %v1005_v38 }
 0x18a   :  { %486 = vmatpush1.bf16.msra.mxu1 %v1008_v39 }
 0x18b   :  { %487 = vmatprep.subr.bf16.mxu1 %v1011_v40 }
 0x18e   :  { %488 = vmatpush1.bf16.msra.mxu1 %v1014_v41 }
 0x224   :  { %v434_v2 = vpop.f32.mrb[0].mxu1 }
 0x225   :  { %v436_v3 = vpop.f32.mrb[1].mxu1 }
 0x226   :  { %v438_v4 = vpop.f32.mrb[2].mxu1 }
 0x227   :  { %v443_v5 = vpack.c.bf16 %v438_v4, %v434_v2  ;;  %v440_v6 = vpop.f32.mrb[3].mxu1 }
 0x228   :  { %v444_v7 = vpack.c.bf16 %v440_v6, %v436_v3 }
 0x22a   :  { %489 = vmatprep.mubr.bf16.mxu1 %v444_v7 }
 0x22b   :  { %490 = vmatmul.mubr.bf16.vlgmr.msra.gmra.mrb[4].mxu1 %v443_v5 }
 0x2fe   :  { %v491_v10 = vpop.f32.mrb[4].mxu1 }
 0x2ff   :  { %v492_v11 = vadd.f32 %v491_v10, %v450_v9  ;;  %v493_v12 = vpop.f32.mrb[5].mxu1 }
 0x300   :  { %v494_v14 = vadd.f32 %v493_v12, %v450_v9  ;;  %v495_v16 = vpop.f32.mrb[6].mxu1 }
 0x301   :  { %v504_v17 = vmin.f32 %v492_v11, 0.0  ;;  %v496_v22 = vadd.f32 %v495_v16, %v455_v13  ;;  %v497_v23 = vpop.f32.mrb[7].mxu1  ;;  %vm500_vm9 = vcmp.gt.f32.partialorder %v492_v11, 0.0 }
 0x302   :  { %v505_v26 = vmin.f32 %v494_v14, 0.0  ;;  %v498_v27 = vadd.f32 %v497_v23, %v455_v13  ;;  %vm501_vm11 = vcmp.gt.f32.partialorder %v494_v14, 0.0 }
 0x303   :  { %v508_v29 = vmul.f32 1.442695, %v504_v17  ;;  %v506_v30 = vmin.f32 %v496_v22, 0.0  ;;  %vm502_vm10 = vcmp.gt.f32.partialorder %v496_v22, 0.0 }
 0x304   :  { %v510_v31 = vmul.f32 1.442695, %v505_v26  ;;  %v507_v32 = vmin.f32 %v498_v27, 0.0  ;;  %vm503_vm12 = vcmp.gt.f32.partialorder %v498_v27, 0.0 }
 0x305   :  { %783 = vpow2.f32 %v508_v29  ;;  %v512_v33 = vmul.f32 1.442695, %v506_v30 }
 0x306   :  { %785 = vpow2.f32 %v510_v31  ;;  %v514_v34 = vmul.f32 1.442695, %v507_v32 }
 0x307   :  { %787 = vpow2.f32 %v512_v33 }
 0x308   :  { %789 = vpow2.f32 %v514_v34 }
 0x30f   :  { %v784_v35 = vpop.eup %783 }
 0x310   :  { %v786_v36 = vpop.eup %785  ;;  %v694_v37 = vadd.f32 -1.0, %v784_v35 }
 0x311   :  { %v788_v38 = vpop.eup %787  ;;  %v695_v39 = vadd.f32 -1.0, %v786_v36 }
 0x312   :  { %v790_v40 = vpop.eup %789  ;;  %v696_v41 = vadd.f32 -1.0, %v788_v38  ;;  %v520_v19 = vsel %vm500_vm9, %v492_v11, %v694_v37 }
 0x313   :  { %v697_v1 = vadd.f32 -1.0, %v790_v40  ;;  %v521_v52 = vsel %vm501_vm11, %v494_v14, %v695_v39 }
 0x314   :  { %v522_v24 = vsel %vm502_vm10, %v496_v22, %v696_v41 }
 0x315   :  { %v701_v42 = vpack.c.bf16 %v522_v24, %v520_v19  ;;  %v523_v54 = vsel %vm503_vm12, %v498_v27, %v697_v1 }
 0x316   :  { %v699_v55 = vpack.c.bf16 %v523_v54, %v521_v52 }
 0x318   :  { %700 = vmatprep.subr.bf16.mxu0 %v699_v55 }
 0x319   :  { %702 = vmatpush1.bf16.msra.mxu0 %v701_v42 }
 0x31c   :  { %698 = vmatmul.mubr.msk.f32.vlgmr.msra.gmra.mrb[8].mxu0 %vm535_vm13, %v524_v56 }
 0x3ef   :  { %v605_v18 = vpop.f32.mrb[8].mxu0 }
 0x3f0   :  { %v606_v20 = vadd.f32 %v605_v18, %v534_v15  ;;  %v607_v21 = vpop.f32.mrb[9].mxu0 }
 0x3f1   :  { %v608_v25 = vadd.f32 %v607_v21, %v534_v15 }
 0x3f3   :  { %v612_v43 = vcombine.low %v606_v20, %v608_v25 }
 0x3f5   :  { %v619_v44 = vrot.slane %v612_v43, %v618_v28 }
 0x3f7   :  { %v626_v45 = vrot.slane %v619_v44, %v618_v28 }
 0x3f9   :  { %632 = vst.msk [vmem:[#allocation6] sm:$0x3] %vm630_vm14, %v626_v45 }
 0x3fa   :  { %824 = shalt.err (!%p821_p12)
}
 0x3fb   :  { %s825_s15 = scalar_lea.hbm %s1084_s7, 32 }
 0x3fc   :  { %p826_p13 = scmp.ne.s32.totalorder %s1084_s7, %s825_s15  ;;  %p829_p0 = scmp.lt.u32.totalorder %s825_s15, %s1084_s7 }
 0x3fe   :  { %p831_p1 = pnand %p829_p0, %p826_p13 }
 0x400   :  { %834 = shalt.err (!%p831_p1)
}
 0x401   :  { %642 = dma.vmem_to_hbm [thread:$0]  %s640_s12, 32, %s1084_s7, [#allocation5]  }
 0x402   :  { %837 = dma.done.wait [#allocation5], 32  }
 0x403   :  { %838 = vsyncadd [#allocation5], 4294967264 }
 0x404   :  { %646 = vsyncpa [#allocation4], 1 }
 0x405   :  { %647 = vsyncpa [#allocation5], 1 }

</bundles_post_ra>
